<compile_context>
chip_gen: v5e
topology: v5e:2x2
jax: 0.10.0
libtpu: 0.0.40
codegen_flags: <defaults>
</compile_context>

<pallas_src>
import math
import jax
import jax.numpy as jnp
from jax import lax
from jax.experimental import pallas as pl
from jax.experimental.pallas import tpu as pltpu

# ---- small synthetic config (mirrors the GPTConfig fields that matter) ----
B = 2
N_HEAD = 2
N_EMBD = 32
HEAD_DIM = N_EMBD // N_HEAD          # 16
HALF = HEAD_DIM // 2                 # 8
LENGTH_FACTOR = 3
T_Q = 8
T_KV = T_Q * LENGTH_FACTOR           # 24 (k_gt_q = True)
RQ = B * T_Q                         # 16 query rows (batch folded)
RK = B * T_KV                        # 48 kv rows (batch folded)
RALL = RQ + RK                       # 64 stacked q|k rows
RMS_EPS = 1.1920929e-07              # torch.finfo(float32).eps (F.rms_norm default)
ATTN_SCALE = 1.0 / math.sqrt(HEAD_DIM)   # 0.25 — power of two, exact when folded into bf16 tables

# Row offsets inside the packed (CONST_ROWS, N_EMBD) bf16 constant slab.
# All offsets are multiples of 16 (bf16 sublane-pack aligned).
MSEL_OFF = 0                          # (N_EMBD, N_EMBD) per-head mean matrix
PSWAP_OFF = MSEL_OFF + N_EMBD         # (N_EMBD, N_EMBD) half-swap permutation
COS_OFF = PSWAP_OFF + N_EMBD          # (RALL, N_EMBD) cos: q rows (scale folded) then k rows
SIN_OFF = COS_OFF + RALL              # (RALL, N_EMBD) sign-folded sin: q rows (scaled) then k rows
CONST_ROWS = SIN_OFF + RALL           # 192


def _rotary_tables(seq_len, dim, base=10000.0):
    """cos/sin tables matching Rotary.forward (bf16-rounded, returned as f32)."""
    inv_freq = 1.0 / (base ** (jnp.arange(0, dim, 2, dtype=jnp.float32) / dim))
    t = jnp.arange(seq_len, dtype=jnp.float32)
    freqs = jnp.outer(t, inv_freq)                      # (seq_len, dim//2)
    cos = jnp.cos(freqs).astype(jnp.bfloat16).astype(jnp.float32)
    sin = jnp.sin(freqs).astype(jnp.bfloat16).astype(jnp.float32)
    return cos, sin


def _full_width_rope(seq_len):
    """(seq_len, N_EMBD) cos / sign-folded sin, heads tiled along lanes.

    RoPE becomes:  y = x * cos_full + swap_halves(x) * sin_signed
    with cos_full = [cos, cos] per head and sin_signed = [+sin, -sin] per head.
    """
    cos, sin = _rotary_tables(seq_len, HEAD_DIM)                 # (T, HALF)
    cos_full = jnp.tile(cos, (1, 2 * N_HEAD))                    # (T, N_EMBD)
    sin_full = jnp.tile(jnp.concatenate([sin, -sin], axis=-1), (1, N_HEAD))
    return cos_full, sin_full


def _build_constants():
    """Packed bf16 constant slab (CONST_ROWS, N_EMBD) and additive f32 mask bias (RQ, RK)."""
    idx = jnp.arange(N_EMBD)
    head = idx // HEAD_DIM
    # (x*x) @ msel == per-head mean of squares, broadcast back across the head.
    msel = (head[:, None] == head[None, :]).astype(jnp.float32) / HEAD_DIM
    # (x @ pswap)[:, j] == x[:, swap(j)]  with swap = rotate-by-HALF within each head.
    swap = head * HEAD_DIM + ((idx % HEAD_DIM) + HALF) % HEAD_DIM
    pswap = jnp.zeros((N_EMBD, N_EMBD), jnp.float32).at[swap, idx].set(1.0)

    cos_q, sin_q = _full_width_rope(T_Q)
    cos_k, sin_k = _full_width_rope(T_KV)
    # Stacked-row tables (q rows first, then k rows); fold the attention scale
    # into the q rows (exact: 0.25 is a power of two).
    cos_rows = jnp.concatenate([jnp.tile(cos_q, (B, 1)) * ATTN_SCALE,
                                jnp.tile(cos_k, (B, 1))], axis=0)            # (RALL, C)
    sin_rows = jnp.concatenate([jnp.tile(sin_q, (B, 1)) * ATTN_SCALE,
                                jnp.tile(sin_k, (B, 1))], axis=0)            # (RALL, C)
    const = jnp.concatenate([msel, pswap, cos_rows, sin_rows], axis=0)
    assert const.shape == (CONST_ROWS, N_EMBD)
    const = const.astype(jnp.bfloat16)   # 1/16, 0/1, bf16-rounded cos/sin: all exact

    # Block mask (q_idx == kv_idx // length_factor) with batch folded into rows:
    # rows of different batches are disconnected via the same-batch condition.
    r = jnp.arange(RQ)
    c = jnp.arange(RK)
    same_batch = (r[:, None] // T_Q) == (c[None, :] // T_KV)
    connect = (r[:, None] % T_Q) == ((c[None, :] % T_KV) // LENGTH_FACTOR)
    bias = jnp.where(same_batch & connect, 0.0, -1e30).astype(jnp.float32)
    return const, bias


def cross_attention_kernel(xq_ref, xkv_ref, wq_ref, wkvp_ref, const_ref, bias_ref, o_ref):
    f32 = jnp.float32
    bf16 = jnp.bfloat16

    # ---- projections (bf16 MXU, f32 acc); K and the (Wv@Wp)-fused V are one slab ----
    q = jnp.dot(xq_ref[...], wq_ref[...], preferred_element_type=f32)        # (RQ, C)
    kvp = jnp.dot(xkv_ref[...], wkvp_ref[...], preferred_element_type=f32)   # (RK, 3C)
    vp_b = kvp[:, N_EMBD:].astype(bf16)                                      # (RK, 2C), cast hoisted

    msel = const_ref[MSEL_OFF:MSEL_OFF + N_EMBD, :]        # bf16
    pswap = const_ref[PSWAP_OFF:PSWAP_OFF + N_EMBD, :]     # bf16
    cos = const_ref[COS_OFF:COS_OFF + RALL, :].astype(f32)
    sin = const_ref[SIN_OFF:SIN_OFF + RALL, :].astype(f32)

    # ---- stacked q|k slab: ONE RMS-norm pass and ONE RoPE pass ----
    qk = jnp.concatenate([q, kvp[:, :N_EMBD]], axis=0)                       # (RALL, C) f32
    mean = jnp.dot((qk * qk).astype(bf16), msel, preferred_element_type=f32)  # per-head mean(x^2)
    qk = qk * lax.rsqrt(mean + RMS_EPS)
    rot = jnp.dot(qk.astype(bf16), pswap, preferred_element_type=f32)        # half-swap via MXU
    # ATTN_SCALE is pre-folded into the q rows of cos/sin.
    qk_b = (qk * cos + rot * sin).astype(bf16)

    q_b = qk_b[:RQ, :]
    k_b = qk_b[RQ:, :]
    bias = bias_ref[...]

    # ---- per-head attention: only the score and PV(+proj) dots are per-head ----
    acc = jnp.zeros((RQ, N_EMBD), f32)
    for h in range(N_HEAD):                                   # static unroll
        lo = h * HEAD_DIM
        s = lax.dot_general(q_b[:, lo:lo + HEAD_DIM], k_b[:, lo:lo + HEAD_DIM],
                            (((1,), (1,)), ((), ())), preferred_element_type=f32) + bias
        # No row-max subtraction: RMS-norm + folded 1/sqrt(d) bound |s_unmasked| <= 4,
        # masked entries (-1e30) underflow exp() to exactly 0.
        p = jnp.exp(s)
        p = p * pl.reciprocal(jnp.sum(p, axis=-1, keepdims=True), approx=True)
        # vp already carries the output projection: acc += p @ (V_h @ Wp_h)
        acc = acc + jnp.dot(p.astype(bf16), vp_b[:, h * N_EMBD:(h + 1) * N_EMBD],
                            preferred_element_type=f32)
    o_ref[...] = acc


@jax.jit
def cross_attention(x_q, x_kv, wq_t, wk_t, wv_t, wp_t):
    const, bias = _build_constants()                       # compile-time constants
    xq = x_q.reshape(RQ, N_EMBD).astype(jnp.bfloat16)
    xkv = x_kv.reshape(RK, N_EMBD).astype(jnp.bfloat16)
    wq = wq_t.astype(jnp.bfloat16)
    # Fold the output projection into V per head at compile time:
    #   p @ (v_h @ Wp_h) == (p @ v_h) @ Wp_h
    wvp = jnp.concatenate(
        [wv_t[:, h * HEAD_DIM:(h + 1) * HEAD_DIM] @ wp_t[h * HEAD_DIM:(h + 1) * HEAD_DIM, :]
         for h in range(N_HEAD)], axis=1)                                    # (C, N_HEAD*C)
    wkvp = jnp.concatenate([wk_t, wvp], axis=1).astype(jnp.bfloat16)         # (C, 3C)

    full2d = lambda shape: pl.BlockSpec(shape, lambda i: (0, 0))
    out = pl.pallas_call(
        cross_attention_kernel,
        out_shape=jax.ShapeDtypeStruct((RQ, N_EMBD), jnp.float32),
        grid=(1,),                                     # single step: batch folded into rows
        in_specs=[
            full2d((RQ, N_EMBD)),                      # x_q  (batch-folded)
            full2d((RK, N_EMBD)),                      # x_kv (batch-folded)
            full2d((N_EMBD, N_EMBD)),                  # Wq
            full2d((N_EMBD, 3 * N_EMBD)),              # [Wk | Wv_h@Wp_h per head]
            full2d((CONST_ROWS, N_EMBD)),              # packed bf16 constants
            full2d((RQ, RK)),                          # additive block-mask bias (f32)
        ],
        out_specs=full2d((RQ, N_EMBD)),
        compiler_params=pltpu.CompilerParams(dimension_semantics=("arbitrary",)),
    )(xq, xkv, wq, wkvp, const, bias)
    return out.reshape(B, T_Q, N_EMBD)


def cross_attention_ref(x_q, x_kv, wq_t, wk_t, wv_t, wp_t):
    """Pure-JAX f32 reference (same math as the PyTorch forward)."""
    cos_q, sin_q = _rotary_tables(T_Q, HEAD_DIM)
    cos_k, sin_k = _rotary_tables(T_KV, HEAD_DIM)
    q = (x_q @ wq_t).reshape(B, T_Q, N_HEAD, HEAD_DIM)
    k = (x_kv @ wk_t).reshape(B, T_KV, N_HEAD, HEAD_DIM)
    v = (x_kv @ wv_t).reshape(B, T_KV, N_HEAD, HEAD_DIM)
    rms = lambda x: x * lax.rsqrt(jnp.mean(x * x, -1, keepdims=True) + RMS_EPS)
    q, k = rms(q), rms(k)

    def rope(x, cos, sin):
        c = cos[None, :, None, :]
        s = sin[None, :, None, :]
        x1, x2 = x[..., :HALF], x[..., HALF:]
        return jnp.concatenate([x1 * c + x2 * s, -x1 * s + x2 * c], axis=-1)

    q, k = rope(q, cos_q, sin_q), rope(k, cos_k, sin_k)
    s = jnp.einsum("bqhd,bkhd->bhqk", q, k) * ATTN_SCALE
    qi = jnp.arange(T_Q)[:, None]
    ki = jnp.arange(T_KV)[None, :]
    mask = qi == (ki // LENGTH_FACTOR)
    s = jnp.where(mask[None, None], s, -jnp.inf)
    p = jax.nn.softmax(s, axis=-1)
    y = jnp.einsum("bhqk,bkhd->bqhd", p, v).reshape(B, T_Q, N_EMBD)
    return y @ wp_t


if __name__ == "__main__":
    key = jax.random.PRNGKey(0)
    k1, k2, k3, k4, k5, k6 = jax.random.split(key, 6)

    x_q = jax.random.normal(k1, (B, T_Q, N_EMBD), jnp.float32)
    x_kv = jax.random.normal(k2, (B, T_KV, N_EMBD), jnp.float32)

    # nn.Linear(n_embd, n_embd, bias=False) weights; stored pre-transposed (in, out).
    scale = 1.0 / math.sqrt(N_EMBD)
    wq_t = jax.random.uniform(k3, (N_EMBD, N_EMBD), jnp.float32, -scale, scale)
    wk_t = jax.random.uniform(k4, (N_EMBD, N_EMBD), jnp.float32, -scale, scale)
    wv_t = jax.random.uniform(k5, (N_EMBD, N_EMBD), jnp.float32, -scale, scale)
    wp_t = jax.random.uniform(k6, (N_EMBD, N_EMBD), jnp.float32, -scale, scale)

    out = cross_attention(x_q, x_kv, wq_t, wk_t, wv_t, wp_t)
    out = jax.block_until_ready(out)

    ref = cross_attention_ref(x_q, x_kv, wq_t, wk_t, wv_t, wp_t)
    assert out.shape == (B, T_Q, N_EMBD)
    # bf16 MXU operands (incl. the msel/pswap trick dots and the fused Wv@Wp)
    # + approx reciprocal -> looser tolerance vs the f32 reference.
    assert jnp.allclose(out, ref, atol=5e-2, rtol=5e-2), "mismatch vs JAX reference"

    print("KERNEL_OK")
</pallas_src>

<mosaic_0001>
module attributes {stable_mosaic.version = 11 : i64} {
  func.func @cross_attention_kernel(%arg0: i32, %arg1: memref<16x32xbf16, #tpu.memory_space<vmem>>, %arg2: memref<48x32xbf16, #tpu.memory_space<vmem>>, %arg3: memref<32x32xbf16, #tpu.memory_space<vmem>>, %arg4: memref<32x96xbf16, #tpu.memory_space<vmem>>, %arg5: memref<192x32xbf16, #tpu.memory_space<vmem>>, %arg6: memref<16x48xf32, #tpu.memory_space<vmem>>, %arg7: memref<16x32xf32, #tpu.memory_space<vmem>>) attributes {dimension_semantics = [#tpu.dimension_semantics<arbitrary>], iteration_bounds = array<i64: 1>, scalar_prefetch = 0 : i64, scratch_operands = 0 : i64, tpu.core_type = #tpu.core_type<tc>, window_params = [{pipeline_mode = #tpu.pipeline_mode<synchronous>, transform_indices = @transform_0, window_bounds = array<i64: 16, 32>}, {pipeline_mode = #tpu.pipeline_mode<synchronous>, transform_indices = @transform_1, window_bounds = array<i64: 48, 32>}, {pipeline_mode = #tpu.pipeline_mode<synchronous>, transform_indices = @transform_2, window_bounds = array<i64: 32, 32>}, {pipeline_mode = #tpu.pipeline_mode<synchronous>, transform_indices = @transform_3, window_bounds = array<i64: 32, 96>}, {pipeline_mode = #tpu.pipeline_mode<synchronous>, transform_indices = @transform_4, window_bounds = array<i64: 192, 32>}, {pipeline_mode = #tpu.pipeline_mode<synchronous>, transform_indices = @transform_5, window_bounds = array<i64: 16, 48>}, {pipeline_mode = #tpu.pipeline_mode<synchronous>, transform_indices = @transform_6, window_bounds = array<i64: 16, 32>}]} {
    %c0 = arith.constant 0 : index
    %c0_0 = arith.constant 0 : index
    %0 = vector.load %arg1[%c0, %c0_0] : memref<16x32xbf16, #tpu.memory_space<vmem>>, vector<16x32xbf16>
    %c0_1 = arith.constant 0 : index
    %c0_2 = arith.constant 0 : index
    %1 = vector.load %arg3[%c0_1, %c0_2] : memref<32x32xbf16, #tpu.memory_space<vmem>>, vector<32x32xbf16>
    %cst = arith.constant dense<0.000000e+00> : vector<16x32xf32>
    %2 = tpu.matmul %0, %1, %cst {dimension_numbers = #tpu.dot_dimension_numbers<[1], [0], [0], [1], [0, 0, 1, 1], [], []>} : vector<16x32xbf16>, vector<32x32xbf16>, vector<16x32xf32> -> vector<16x32xf32>
    %c0_3 = arith.constant 0 : index
    %c0_4 = arith.constant 0 : index
    %3 = vector.load %arg2[%c0_3, %c0_4] : memref<48x32xbf16, #tpu.memory_space<vmem>>, vector<48x32xbf16>
    %c0_5 = arith.constant 0 : index
    %c0_6 = arith.constant 0 : index
    %4 = vector.load %arg4[%c0_5, %c0_6] : memref<32x96xbf16, #tpu.memory_space<vmem>>, vector<32x96xbf16>
    %cst_7 = arith.constant dense<0.000000e+00> : vector<48x96xf32>
    %5 = tpu.matmul %3, %4, %cst_7 {dimension_numbers = #tpu.dot_dimension_numbers<[1], [0], [0], [1], [0, 0, 1, 1], [], []>} : vector<48x32xbf16>, vector<32x96xbf16>, vector<48x96xf32> -> vector<48x96xf32>
    %6 = vector.extract_strided_slice %5 {offsets = [0, 32], sizes = [48, 64], strides = [1, 1]} : vector<48x96xf32> to vector<48x64xf32>
    %7 = arith.truncf %6 : vector<48x64xf32> to vector<48x64xbf16>
    %c0_8 = arith.constant 0 : index
    %c0_9 = arith.constant 0 : index
    %8 = vector.load %arg5[%c0_8, %c0_9] : memref<192x32xbf16, #tpu.memory_space<vmem>>, vector<32x32xbf16>
    %c32 = arith.constant 32 : index
    %c0_10 = arith.constant 0 : index
    %9 = vector.load %arg5[%c32, %c0_10] : memref<192x32xbf16, #tpu.memory_space<vmem>>, vector<32x32xbf16>
    %c64 = arith.constant 64 : index
    %c0_11 = arith.constant 0 : index
    %10 = vector.load %arg5[%c64, %c0_11] : memref<192x32xbf16, #tpu.memory_space<vmem>>, vector<64x32xbf16>
    %11 = arith.extf %10 : vector<64x32xbf16> to vector<64x32xf32>
    %c128 = arith.constant 128 : index
    %c0_12 = arith.constant 0 : index
    %12 = vector.load %arg5[%c128, %c0_12] : memref<192x32xbf16, #tpu.memory_space<vmem>>, vector<64x32xbf16>
    %13 = arith.extf %12 : vector<64x32xbf16> to vector<64x32xf32>
    %14 = vector.extract_strided_slice %5 {offsets = [0, 0], sizes = [48, 32], strides = [1, 1]} : vector<48x96xf32> to vector<48x32xf32>
    %15 = tpu.concatenate %2, %14 in 0 : vector<16x32xf32>, vector<48x32xf32> -> vector<64x32xf32>
    %16 = arith.mulf %15, %15 : vector<64x32xf32>
    %17 = arith.truncf %16 : vector<64x32xf32> to vector<64x32xbf16>
    %cst_13 = arith.constant dense<0.000000e+00> : vector<64x32xf32>
    %18 = tpu.matmul %17, %8, %cst_13 {dimension_numbers = #tpu.dot_dimension_numbers<[1], [0], [0], [1], [0, 0, 1, 1], [], []>} : vector<64x32xbf16>, vector<32x32xbf16>, vector<64x32xf32> -> vector<64x32xf32>
    %cst_14 = arith.constant 1.1920929E-7 : f32
    %19 = vector.broadcast %cst_14 : f32 to vector<64x32xf32>
    %20 = arith.addf %18, %19 : vector<64x32xf32>
    %21 = math.rsqrt %20 : vector<64x32xf32>
    %22 = arith.mulf %15, %21 : vector<64x32xf32>
    %23 = arith.truncf %22 : vector<64x32xf32> to vector<64x32xbf16>
    %cst_15 = arith.constant dense<0.000000e+00> : vector<64x32xf32>
    %24 = tpu.matmul %23, %9, %cst_15 {dimension_numbers = #tpu.dot_dimension_numbers<[1], [0], [0], [1], [0, 0, 1, 1], [], []>} : vector<64x32xbf16>, vector<32x32xbf16>, vector<64x32xf32> -> vector<64x32xf32>
    %25 = arith.mulf %22, %11 : vector<64x32xf32>
    %26 = arith.mulf %24, %13 : vector<64x32xf32>
    %27 = arith.addf %25, %26 : vector<64x32xf32>
    %28 = arith.truncf %27 : vector<64x32xf32> to vector<64x32xbf16>
    %29 = vector.extract_strided_slice %28 {offsets = [0, 0], sizes = [16, 32], strides = [1, 1]} : vector<64x32xbf16> to vector<16x32xbf16>
    %30 = vector.extract_strided_slice %28 {offsets = [16, 0], sizes = [48, 32], strides = [1, 1]} : vector<64x32xbf16> to vector<48x32xbf16>
    %c0_16 = arith.constant 0 : index
    %c0_17 = arith.constant 0 : index
    %31 = vector.load %arg6[%c0_16, %c0_17] : memref<16x48xf32, #tpu.memory_space<vmem>>, vector<16x48xf32>
    %cst_18 = arith.constant 0.000000e+00 : f32
    %32 = vector.broadcast %cst_18 : f32 to vector<16x32xf32>
    %33 = vector.extract_strided_slice %29 {offsets = [0, 0], sizes = [16, 16], strides = [1, 1]} : vector<16x32xbf16> to vector<16x16xbf16>
    %34 = vector.extract_strided_slice %30 {offsets = [0, 0], sizes = [48, 16], strides = [1, 1]} : vector<48x32xbf16> to vector<48x16xbf16>
    %cst_19 = arith.constant dense<0.000000e+00> : vector<16x48xf32>
    %35 = tpu.matmul %33, %34, %cst_19 {dimension_numbers = #tpu.dot_dimension_numbers<[1], [1], [0], [0], [0, 0, 1, 0], [], []>} : vector<16x16xbf16>, vector<48x16xbf16>, vector<16x48xf32> -> vector<16x48xf32>
    %36 = arith.addf %35, %31 : vector<16x48xf32>
    %37 = math.exp %36 : vector<16x48xf32>
    %cst_20 = arith.constant dense<0.000000e+00> : vector<16xf32>
    %38 = vector.multi_reduction <add>, %37, %cst_20 [1] : vector<16x48xf32> to vector<16xf32>
    %39 = vector.shape_cast %38 : vector<16xf32> to vector<16x1xf32>
    %40 = tpu.reciprocal %39 {approx = true} : vector<16x1xf32> -> vector<16x1xf32>
    %41 = vector.broadcast %40 : vector<16x1xf32> to vector<16x48xf32>
    %42 = arith.mulf %37, %41 : vector<16x48xf32>
    %43 = arith.truncf %42 : vector<16x48xf32> to vector<16x48xbf16>
    %44 = vector.extract_strided_slice %7 {offsets = [0, 0], sizes = [48, 32], strides = [1, 1]} : vector<48x64xbf16> to vector<48x32xbf16>
    %cst_21 = arith.constant dense<0.000000e+00> : vector<16x32xf32>
    %45 = tpu.matmul %43, %44, %cst_21 {dimension_numbers = #tpu.dot_dimension_numbers<[1], [0], [0], [1], [0, 0, 1, 1], [], []>} : vector<16x48xbf16>, vector<48x32xbf16>, vector<16x32xf32> -> vector<16x32xf32>
    %46 = arith.addf %32, %45 : vector<16x32xf32>
    %47 = vector.extract_strided_slice %29 {offsets = [0, 16], sizes = [16, 16], strides = [1, 1]} : vector<16x32xbf16> to vector<16x16xbf16>
    %48 = vector.extract_strided_slice %30 {offsets = [0, 16], sizes = [48, 16], strides = [1, 1]} : vector<48x32xbf16> to vector<48x16xbf16>
    %cst_22 = arith.constant dense<0.000000e+00> : vector<16x48xf32>
    %49 = tpu.matmul %47, %48, %cst_22 {dimension_numbers = #tpu.dot_dimension_numbers<[1], [1], [0], [0], [0, 0, 1, 0], [], []>} : vector<16x16xbf16>, vector<48x16xbf16>, vector<16x48xf32> -> vector<16x48xf32>
    %50 = arith.addf %49, %31 : vector<16x48xf32>
    %51 = math.exp %50 : vector<16x48xf32>
    %cst_23 = arith.constant dense<0.000000e+00> : vector<16xf32>
    %52 = vector.multi_reduction <add>, %51, %cst_23 [1] : vector<16x48xf32> to vector<16xf32>
    %53 = vector.shape_cast %52 : vector<16xf32> to vector<16x1xf32>
    %54 = tpu.reciprocal %53 {approx = true} : vector<16x1xf32> -> vector<16x1xf32>
    %55 = vector.broadcast %54 : vector<16x1xf32> to vector<16x48xf32>
    %56 = arith.mulf %51, %55 : vector<16x48xf32>
    %57 = arith.truncf %56 : vector<16x48xf32> to vector<16x48xbf16>
    %58 = vector.extract_strided_slice %7 {offsets = [0, 32], sizes = [48, 32], strides = [1, 1]} : vector<48x64xbf16> to vector<48x32xbf16>
    %cst_24 = arith.constant dense<0.000000e+00> : vector<16x32xf32>
    %59 = tpu.matmul %57, %58, %cst_24 {dimension_numbers = #tpu.dot_dimension_numbers<[1], [0], [0], [1], [0, 0, 1, 1], [], []>} : vector<16x48xbf16>, vector<48x32xbf16>, vector<16x32xf32> -> vector<16x32xf32>
    %60 = arith.addf %46, %59 : vector<16x32xf32>
    %c0_25 = arith.constant 0 : index
    %c0_26 = arith.constant 0 : index
    %61 = vector.load %arg7[%c0_25, %c0_26] : memref<16x32xf32, #tpu.memory_space<vmem>>, vector<16x32xf32>
    tpu.vector_store %arg7[%c0_25, %c0_26], %60 {strides = array<i32>} : memref<16x32xf32, #tpu.memory_space<vmem>>, vector<16x32xf32>,
    return
  }
  func.func @transform_0(%arg0: i32) -> (i32, i32) {
    %c0_i32 = arith.constant 0 : i32
    %c0_i32_0 = arith.constant 0 : i32
    %c0_i32_1 = arith.constant 0 : i32
    return %c0_i32, %c0_i32_0 : i32, i32
  }
  func.func @transform_1(%arg0: i32) -> (i32, i32) {
    %c0_i32 = arith.constant 0 : i32
    %c0_i32_0 = arith.constant 0 : i32
    %c0_i32_1 = arith.constant 0 : i32
    return %c0_i32, %c0_i32_0 : i32, i32
  }
  func.func @transform_2(%arg0: i32) -> (i32, i32) {
    %c0_i32 = arith.constant 0 : i32
    %c0_i32_0 = arith.constant 0 : i32
    %c0_i32_1 = arith.constant 0 : i32
    return %c0_i32, %c0_i32_0 : i32, i32
  }
  func.func @transform_3(%arg0: i32) -> (i32, i32) {
    %c0_i32 = arith.constant 0 : i32
    %c0_i32_0 = arith.constant 0 : i32
    %c0_i32_1 = arith.constant 0 : i32
    return %c0_i32, %c0_i32_0 : i32, i32
  }
  func.func @transform_4(%arg0: i32) -> (i32, i32) {
    %c0_i32 = arith.constant 0 : i32
    %c0_i32_0 = arith.constant 0 : i32
    %c0_i32_1 = arith.constant 0 : i32
    return %c0_i32, %c0_i32_0 : i32, i32
  }
  func.func @transform_5(%arg0: i32) -> (i32, i32) {
    %c0_i32 = arith.constant 0 : i32
    %c0_i32_0 = arith.constant 0 : i32
    %c0_i32_1 = arith.constant 0 : i32
    return %c0_i32, %c0_i32_0 : i32, i32
  }
  func.func @transform_6(%arg0: i32) -> (i32, i32) {
    %c0_i32 = arith.constant 0 : i32
    %c0_i32_0 = arith.constant 0 : i32
    %c0_i32_1 = arith.constant 0 : i32
    return %c0_i32, %c0_i32_0 : i32, i32
  }
}

</mosaic_0001>

<bundles_post_ra>
// kernel: cross_attention.1
= control target key start
LH: loop header
LB: loop body
LE: loop exit
PB: predicated region body
PF: predicated region fallthrough
CT: control target
= control target key end

     0   :  { %s1048_s0 = inlined_call_operand.vmem [shape: bf16[16,32], index: 0, kind: input, shape index: {}]   ;;  %s1049_s1 = inlined_call_operand.vmem [shape: bf16[48,32], index: 1, kind: input, shape index: {}]   ;;  %s1050_s2 = inlined_call_operand.vmem [shape: bf16[32,32], index: 2, kind: input, shape index: {}]   ;;  %s1051_s3 = inlined_call_operand.vmem [shape: bf16[32,96], index: 3, kind: input, shape index: {}]   ;;  %s1052_s4 = inlined_call_operand.vmem [shape: bf16[192,32], index: 4, kind: input, shape index: {}]   ;;  %s1053_s5 = inlined_call_operand.vmem [shape: f32[16,48], index: 5, kind: input, shape index: {}]   ;;  %s1054_s6 = inlined_call_operand.hbm [shape: f32[16,32], index: 6, kind: output, shape index: {}]  }
   0x1   :  { %v691_v0 = vld [vmem:[%s1050_s2 + $0x8] sm:$0xff]  ;;  %v690_v2 = vld [vmem:[%s1050_s2] sm:$0xff] }
   0x2   :  { %v696_v1 = vld [vmem:[%s1051_s3 + $0x8] sm:$0xff]  ;;  %58 = vmatpush.bf16.msra.mxu0 %v691_v0  ;;  %v695_v3 = vld [vmem:[%s1051_s3] sm:$0xff] }
   0x3   :  { %118 = vmatpush.bf16.msra.mxu1 %v696_v1 }
   0x4   :  { %11 = vsyncpa [#allocation3], 0  ;;  %v689_v4 = vld [vmem:[%s1048_s0] sm:$0xff]  ;;  %vm48_vm0 = vcmask 261120   ;;  %v693_v6 = vld [vmem:[%s1049_s1 + $0x8] sm:$0xff]  ;;  %s806_s14 = smov 96  }
   0x5   :  { %v692_v5 = vld [vmem:[%s1049_s1] sm:$0xff]  ;;  %v694_v7 = vld [vmem:[%s1049_s1 + $0x10] sm:$0xff]  ;;  %v698_v8 = vld [vmem:[%s1052_s4 + $0x8] sm:$0xff]  ;;  %s805_s1 = smov 64   ;;  %s807_s7 = smov 112  }
   0x6   :  { %59 = vmatpush.bf16.msra.mxu0 %v690_v2  ;;  %224 = vmatpush.bf16.msra.mxu2 %v698_v8  ;;  %v697_v9 = vld [vmem:[%s1052_s4] sm:$0xff]  ;;  %v700_v40 = vld [vmem:[%s1052_s4 + $0x18] sm:$0xff]  ;;  %v699_v42 = vld [vmem:[%s1052_s4 + $0x10] sm:$0xff]  ;;  %s809_s15 = smov 128   ;;  %s810_s16 = smov 8  }
   0x7   :  { %119 = vmatpush.bf16.msra.mxu1 %v695_v3  ;;  %369 = vmatpush.bf16.msra.mxu3 %v700_v40 }
   0x9   :  { %637 = vmatmul.msk.bf16.vlgmr.msra.gmra.mxu0 %vm48_vm0, %v689_v4 }
   0xa   :  { %658 = vmatmul.msk.bf16.vlgmr.msra.gmra.mxu1 %vm48_vm0, %v692_v5  ;;  %225 = vmatpush.bf16.msra.mxu2 %v697_v9 }
   0xb   :  { %370 = vmatpush.bf16.msra.mxu3 %v699_v42 }
  0x1a   :  { %659 = vmatmul.msk.bf16.gmra.mxu1 %vm48_vm0, %v693_v6 }
  0x2a   :  { %660 = vmatmul.msk.bf16.gmra.mxu1 %vm48_vm0, %v694_v7 }
  0x86   :  { %v880_v10 = vpop.f32.mrf.mxu0 }
  0x87   :  { %v882_v11 = vpop.f32.mrf.mxu1  ;;  %v182_v14 = vmul.f32 %v880_v10, %v880_v10 }
  0x88   :  { %v184_v18 = vmul.f32 %v882_v11, %v882_v11 }
  0x8e   :  { %v884_v12 = vpop.f32.mrf.mxu0 }
  0x8f   :  { %v886_v13 = vpop.f32.mrf.mxu1  ;;  %v183_v15 = vmul.f32 %v884_v12, %v884_v12 }
  0x90   :  { %v185_v19 = vmul.f32 %v886_v13, %v886_v13 }
  0x91   :  { %v190_v16 = vpack.c.bf16 %v183_v15, %v182_v14 }
  0x92   :  { %v191_v21 = vpack.c.bf16 %v185_v19, %v184_v18 }
  0x93   :  { %669 = vmatmul.msk.bf16.vlgmr.msra.gmra.mxu2 %vm48_vm0, %v190_v16 }
  0x97   :  { %v893_v17 = vpop.f32.mrf.mxu1 }
  0x98   :  { %v186_v24 = vmul.f32 %v893_v17, %v893_v17  ;;  %v138_v32 = vpack.c.bf16 %v893_v17, %v893_v17 }
  0x9a   :  { %v546_v36 = vunpack.c.l.b16 %v138_v32 }
  0x9f   :  { %v899_v20 = vpop.f32.mrf.mxu1 }
  0xa0   :  { %v187_v25 = vmul.f32 %v899_v20, %v899_v20  ;;  %v139_v33 = vpack.c.bf16 %v899_v20, %v899_v20 }
  0xa2   :  { %v192_v29 = vpack.c.bf16 %v187_v25, %v186_v24  ;;  %v547_v37 = vunpack.c.l.b16 %v139_v33 }
  0xa3   :  { %670 = vmatmul.msk.bf16.gmra.mxu2 %vm48_vm0, %v191_v21 }
  0xa4   :  { %v926_v39 = vpack.c.b16 %v547_v37, %v546_v36 }
  0xa7   :  { %v902_v22 = vpop.f32.mrf.mxu1 }
  0xa8   :  { %v140_v23 = vpack.c.bf16 %v902_v22, %v902_v22  ;;  %v188_v34 = vmul.f32 %v902_v22, %v902_v22 }
  0xaa   :  { %v548_v28 = vunpack.c.l.b16 %v140_v23 }
  0xaf   :  { %v910_v26 = vpop.f32.mrf.mxu1 }
  0xb0   :  { %v141_v27 = vpack.c.bf16 %v910_v26, %v910_v26  ;;  %v189_v35 = vmul.f32 %v910_v26, %v910_v26 }
  0xb2   :  { %v549_v30 = vunpack.c.l.b16 %v141_v27  ;;  %v193_v38 = vpack.c.bf16 %v189_v35, %v188_v34 }
  0xb3   :  { %671 = vmatmul.msk.bf16.gmra.mxu2 %vm48_vm0, %v192_v29 }
  0xb4   :  { %v552_v31 = vpack.c.b16 %v549_v30, %v548_v28 }
  0xb6   :  { %557 = vrot.lane.b32.xlu2 %v552_v31, %s805_s1 }
  0xbe   :  { %583 = vrot.lane.b32.xlu2 %v552_v31, %s806_s14 }
  0xc3   :  { %672 = vmatmul.msk.bf16.gmra.mxu2 %vm48_vm0, %v193_v38 }
  0xc6   :  { %555 = vrot.lane.b32.xlu2 %v926_v39, %s805_s1 }
 0x110   :  { %v558_v41 = vpop.permute.xlu2 %557 }
 0x111   :  { %570 = vmatpush.bf16.msrb.mxu1 %v558_v41 }
 0x116   :  { %v227_v43 = vpop.f32.mrf.mxu2 }
 0x117   :  { %v228_v44 = vadd.f32 1.1920929e-07, %v227_v43 }
 0x118   :  { %v936_v45 = vpop.permute.xlu2 %583 }
 0x119   :  { %747 = vrsqrt.f32 %v228_v44  ;;  %vm253_vm2 = vweird.f32 %v228_v44 }
 0x11e   :  { %v229_v46 = vpop.f32.mrf.mxu2 }
 0x11f   :  { %v748_v47 = vpop.eup %747  ;;  %v230_v48 = vadd.f32 1.1920929e-07, %v229_v46 }
 0x120   :  { %v556_v49 = vpop.permute.xlu2 %555  ;;  %v248_v50 = vmul.f32 %v748_v47, %v228_v44  ;;  %vm254_vm1 = vweird.f32 %v748_v47 }
 0x121   :  { %571 = vmatpush.bf16.msrb.mxu1 %v556_v49  ;;  %749 = vrsqrt.f32 %v230_v48  ;;  %vm255_vm4 = vmor %vm253_vm2, %vm254_vm1  ;;  %vm263_vm5 = vweird.f32 %v230_v48 }
 0x122   :  { %v249_v51 = vmul.f32 %v748_v47, %v248_v50 }
 0x124   :  { %v250_v52 = vmul.f32 0.5, %v249_v51 }
 0x126   :  { %v232_v53 = vpop.f32.mrf.mxu2  ;;  %v251_v56 = vsub.f32 1.5, %v250_v52 }
 0x127   :  { %v750_v54 = vpop.eup %749  ;;  %v233_v55 = vadd.f32 1.1920929e-07, %v232_v53 }
 0x128   :  { %v258_v57 = vmul.f32 %v750_v54, %v230_v48  ;;  %v252_v59 = vmul.f32 %v748_v47, %v251_v56  ;;  %vm264_vm3 = vweird.f32 %v750_v54 }
 0x129   :  { %751 = vrsqrt.f32 %v233_v55  ;;  %vm265_vm6 = vmor %vm263_vm5, %vm264_vm3  ;;  %vm273_vm8 = vweird.f32 %v233_v55 }
 0x12a   :  { %v259_v58 = vmul.f32 %v750_v54, %v258_v57  ;;  %v256_v3 = vsel %vm255_vm4, %v748_v47, %v252_v59 }
 0x12b   :  { %v939_v6 = vmul.f32 %v256_v3, %v880_v10 }
 0x12c   :  { %v260_v60 = vmul.f32 0.5, %v259_v58 }
 0x12e   :  { %v261_v61 = vsub.f32 1.5, %v260_v60  ;;  %v234_v62 = vpop.f32.mrf.mxu2 }
 0x12f   :  { %v752_v63 = vpop.eup %751  ;;  %v235_v0 = vadd.f32 1.1920929e-07, %v234_v62 }
 0x130   :  { %v262_v1 = vmul.f32 %v750_v54, %v261_v61  ;;  %v268_v2 = vmul.f32 %v752_v63, %v233_v55  ;;  %vm274_vm7 = vweird.f32 %v752_v63 }
 0x131   :  { %753 = vrsqrt.f32 %v235_v0  ;;  %vm275_vm10 = vmor %vm273_vm8, %vm274_vm7  ;;  %vm283_vm11 = vweird.f32 %v235_v0 }
 0x132   :  { %v269_v4 = vmul.f32 %v752_v63, %v268_v2  ;;  %v266_v5 = vsel %vm265_vm6, %v750_v54, %v262_v1 }
 0x133   :  { %v942_v7 = vmul.f32 %v266_v5, %v884_v12 }
 0x134   :  { %v270_v8 = vmul.f32 0.5, %v269_v4 }
 0x135   :  { %v335_v9 = vpack.c.bf16 %v942_v7, %v939_v6 }
 0x136   :  { %v237_v14 = vpop.f32.mrf.mxu2  ;;  %v271_v18 = vsub.f32 1.5, %v270_v8 }
 0x137   :  { %v754_v15 = vpop.eup %753  ;;  %v238_v16 = vadd.f32 1.1920929e-07, %v237_v14  ;;  %681 = vmatmul.msk.bf16.vlgmr.msra.gmra.mxu3 %vm48_vm0, %v335_v9  ;;  %v737_v9 = vld [vmem:[%s1052_s4 + $0x40] sm:$0xff]  }
 0x138   :  { %v278_v19 = vmul.f32 %v754_v15, %v235_v0  ;;  %v272_v23 = vmul.f32 %v752_v63, %v271_v18  ;;  %vm284_vm9 = vweird.f32 %v754_v15  ;;  %v733_v14 = vld [vmem:[%s1052_s4 + $0x20] sm:$0xff]  }
 0x139   :  { %755 = vrsqrt.f32 %v238_v16  ;;  %vm285_vm12 = vmor %vm283_vm11, %vm284_vm9  ;;  %vm293_vm14 = vweird.f32 %v238_v16  ;;  %vm477_vm11 = vcmask 392192  }
 0x13a   :  { %v279_v21 = vmul.f32 %v754_v15, %v278_v19  ;;  %v276_v30 = vsel %vm275_vm10, %v752_v63, %v272_v23  ;;  %v704_v19 = vunpack.c.h.bf16 %v733_v14  ;;  %vm446_vm10 = vcmask 130048  }
 0x13b   :  { %v948_v33 = vmul.f32 %v276_v30, %v882_v11  ;;  %v734_v30 = vld [vmem:[%s1052_s4 + $0x28] sm:$0xff]  }
 0x13c   :  { %v280_v10 = vmul.f32 0.5, %v279_v21  ;;  %v720_v21 = vunpack.c.h.bf16 %v737_v9 }
 0x13e   :  { %v281_v24 = vsub.f32 1.5, %v280_v10  ;;  %v239_v12 = vpop.f32.mrf.mxu2 }
 0x13f   :  { %v756_v25 = vpop.eup %755  ;;  %v240_v27 = vadd.f32 1.1920929e-07, %v239_v12 }
 0x140   :  { %v282_v28 = vmul.f32 %v754_v15, %v281_v24  ;;  %v288_v29 = vmul.f32 %v756_v25, %v238_v16  ;;  %vm294_vm13 = vweird.f32 %v756_v25  ;;  %v393_v24 = vmul.f32 %v704_v19, %v942_v7 }
 0x141   :  { %757 = vrsqrt.f32 %v240_v27  ;;  %vm295_vm1 = vmor %vm293_vm14, %vm294_vm13  ;;  %vm303_vm2 = vweird.f32 %v240_v27 }
 0x142   :  { %v289_v31 = vmul.f32 %v756_v25, %v288_v29  ;;  %v286_v32 = vsel %vm285_vm12, %v754_v15, %v282_v28  ;;  %v719_v15 = vunpack.c.l.bf16 %v737_v9  ;;  %v738_v28 = vld [vmem:[%s1052_s4 + $0x48] sm:$0xff]  }
 0x143   :  { %v951_v34 = vmul.f32 %v286_v32, %v886_v13  ;;  %v723_v32 = vunpack.c.l.bf16 %v738_v28 }
 0x144   :  { %v290_v35 = vmul.f32 0.5, %v289_v31 }
 0x145   :  { %v336_v36 = vpack.c.bf16 %v951_v34, %v948_v33 }
 0x146   :  { %v242_v37 = vpop.f32.mrf.mxu2  ;;  %v291_v41 = vsub.f32 1.5, %v290_v35 }
 0x147   :  { %v758_v38 = vpop.eup %757  ;;  %v243_v40 = vadd.f32 1.1920929e-07, %v242_v37  ;;  %682 = vmatmul.msk.bf16.gmra.mxu3 %vm48_vm0, %v336_v36  ;;  %v707_v36 = vunpack.c.l.bf16 %v734_v30 }
 0x148   :  { %v298_v42 = vmul.f32 %v758_v38, %v240_v27  ;;  %v292_v44 = vmul.f32 %v756_v25, %v291_v41  ;;  %vm304_vm15 = vweird.f32 %v758_v38  ;;  %v724_v41 = vunpack.c.h.bf16 %v738_v28 }
 0x149   :  { %759 = vrsqrt.f32 %v243_v40  ;;  %vm305_vm3 = vmor %vm303_vm2, %vm304_vm15  ;;  %vm313_vm5 = vweird.f32 %v243_v40 }
 0x14a   :  { %v299_v43 = vmul.f32 %v758_v38, %v298_v42  ;;  %v296_v53 = vsel %vm295_vm1, %v756_v25, %v292_v44 }
 0x14b   :  { %v957_v56 = vmul.f32 %v296_v53, %v893_v17 }
 0x14c   :  { %v300_v46 = vmul.f32 0.5, %v299_v43 }
 0x14e   :  { %v301_v47 = vsub.f32 1.5, %v300_v46  ;;  %v244_v48 = vpop.f32.mrf.mxu2 }
 0x14f   :  { %v760_v49 = vpop.eup %759  ;;  %v245_v50 = vadd.f32 1.1920929e-07, %v244_v48 }
 0x150   :  { %v302_v51 = vmul.f32 %v758_v38, %v301_v47  ;;  %v308_v52 = vmul.f32 %v760_v49, %v243_v40  ;;  %vm314_vm4 = vweird.f32 %v760_v49  ;;  %v708_v40 = vunpack.c.h.bf16 %v734_v30 }
 0x151   :  { %761 = vrsqrt.f32 %v245_v50  ;;  %vm315_vm7 = vmor %vm313_vm5, %vm314_vm4  ;;  %vm323_vm8 = vweird.f32 %v245_v50 }
 0x152   :  { %v309_v54 = vmul.f32 %v760_v49, %v308_v52  ;;  %v306_v55 = vsel %vm305_vm3, %v758_v38, %v302_v51  ;;  %v394_v38 = vmul.f32 %v707_v36, %v948_v33  ;;  %v395_v44 = vmul.f32 %v708_v40, %v951_v34  ;;  %v735_v51 = vld [vmem:[%s1052_s4 + $0x30] sm:$0xff]  }
 0x153   :  { %v960_v57 = vmul.f32 %v306_v55, %v899_v20  ;;  %v711_v55 = vunpack.c.l.bf16 %v735_v51 }
 0x154   :  { %v310_v58 = vmul.f32 0.5, %v309_v54 }
 0x155   :  { %v337_v59 = vpack.c.bf16 %v960_v57, %v957_v56  ;;  %v396_v34 = vmul.f32 %v711_v55, %v957_v56  ;;  %v736_v56 = vld [vmem:[%s1052_s4 + $0x38] sm:$0xff]  }
 0x156   :  { %v311_v61 = vsub.f32 1.5, %v310_v58 }
 0x157   :  { %v762_v60 = vpop.eup %761  ;;  %683 = vmatmul.msk.bf16.gmra.mxu3 %vm48_vm0, %v337_v59 }
 0x158   :  { %v318_v62 = vmul.f32 %v762_v60, %v245_v50  ;;  %v312_v0 = vmul.f32 %v760_v49, %v311_v61  ;;  %vm324_vm6 = vweird.f32 %v762_v60 }
 0x159   :  { %vm325_vm9 = vmor %vm323_vm8, %vm324_vm6 }
 0x15a   :  { %v319_v63 = vmul.f32 %v762_v60, %v318_v62  ;;  %v316_v20 = vsel %vm315_vm7, %v760_v49, %v312_v0  ;;  %v739_v49 = vld [vmem:[%s1052_s4 + $0x50] sm:$0xff]  }
 0x15b   :  { %v966_v4 = vmul.f32 %v316_v20, %v902_v22  ;;  %v703_v22 = vunpack.c.l.bf16 %v733_v14  ;;  %v727_v52 = vunpack.c.l.bf16 %v739_v49  ;;  %v728_v61 = vunpack.c.h.bf16 %v739_v49  ;;  %v740_v20 = vld [vmem:[%s1052_s4 + $0x58] sm:$0xff]  }
 0x15c   :  { %v320_v1 = vmul.f32 0.5, %v319_v63  ;;  %v731_v14 = vunpack.c.l.bf16 %v740_v20  ;;  %v732_v19 = vunpack.c.h.bf16 %v740_v20 }
 0x15e   :  { %v321_v2 = vsub.f32 1.5, %v320_v1 }
 0x160   :  { %v322_v17 = vmul.f32 %v762_v60, %v321_v2 }
 0x162   :  { %v326_v3 = vsel %vm325_vm9, %v762_v60, %v322_v17  ;;  %v712_v60 = vunpack.c.h.bf16 %v735_v51 }
 0x163   :  { %v969_v5 = vmul.f32 %v326_v3, %v910_v26  ;;  %v392_v26 = vmul.f32 %v703_v22, %v939_v6 }
 0x164   :  { %v397_v0 = vmul.f32 %v712_v60, %v960_v57  ;;  %v715_v57 = vunpack.c.l.bf16 %v736_v56 }
 0x165   :  { %v338_v8 = vpack.c.bf16 %v969_v5, %v966_v4 }
 0x167   :  { %684 = vmatmul.msk.bf16.gmra.mxu3 %vm48_vm0, %v338_v8 }
 0x1ba   :  { %v372_v16 = vpop.f32.mrf.mxu3 }
 0x1bb   :  { %v400_v18 = vmul.f32 %v719_v15, %v372_v16 }
 0x1bd   :  { %v408_v23 = vadd.f32 %v400_v18, %v392_v26  ;;  %v398_v18 = vmul.f32 %v715_v57, %v966_v4  ;;  %v716_v26 = vunpack.c.h.bf16 %v736_v56 }
 0x1bf   :  { %v416_v25 = vpack.c.bf16 %v408_v23, %v408_v23 }
 0x1c1   :  { %v428_v31 = vunpack.c.l.b16 %v416_v25 }
 0x1c2   :  { %v374_v10 = vpop.f32.mrf.mxu3 }
 0x1c3   :  { %v401_v12 = vmul.f32 %v720_v21, %v374_v10  ;;  %v399_v10 = vmul.f32 %v716_v26, %v969_v5 }
 0x1c5   :  { %v409_v27 = vadd.f32 %v401_v12, %v393_v24 }
 0x1c7   :  { %v417_v29 = vpack.c.bf16 %v409_v27, %v409_v27 }
 0x1c9   :  { %v429_v6 = vunpack.c.l.b16 %v417_v29 }
 0x1ca   :  { %v377_v35 = vpop.f32.mrf.mxu3 }
 0x1cb   :  { %v988_v37 = vpack.c.b16 %v429_v6, %v428_v31  ;;  %v402_v7 = vmul.f32 %v723_v32, %v377_v35 }
 0x1cd   :  { %v410_v42 = vadd.f32 %v402_v7, %v394_v38 }
 0x1cf   :  { %v418_v47 = vpack.c.bf16 %v410_v42, %v410_v42 }
 0x1d1   :  { %v437_v33 = vunpack.c.l.b16 %v418_v47 }
 0x1d2   :  { %v379_v43 = vpop.f32.mrf.mxu3 }
 0x1d3   :  { %v403_v46 = vmul.f32 %v724_v41, %v379_v43 }
 0x1d5   :  { %v411_v48 = vadd.f32 %v403_v46, %v395_v44  ;;  %v425_v44 = vld [vmem:[%s1053_s5 + $0x8] sm:$0xff] }
 0x1d7   :  { %v419_v50 = vpack.c.bf16 %v411_v48, %v411_v48 }
 0x1d9   :  { %v438_v53 = vunpack.c.l.b16 %v419_v50 }
 0x1da   :  { %v382_v54 = vpop.f32.mrf.mxu3 }
 0x1db   :  { %v443_v58 = vpack.c.b16 %v438_v53, %v437_v33  ;;  %v404_v59 = vmul.f32 %v727_v52, %v382_v54 }
 0x1dd   :  { %491 = vrot.lane.b32.xlu1 %v443_v58, %s807_s7  ;;  %v412_v62 = vadd.f32 %v404_v59, %v396_v34  ;;  %v451_v5 = vsel %vm446_vm10, %v443_v58, 0 }
 0x1df   :  { %v420_v2 = vpack.c.bf16 %v412_v62, %v412_v62 }
 0x1e1   :  { %v439_v8 = vunpack.c.l.b16 %v420_v2 }
 0x1e2   :  { %v384_v63 = vpop.f32.mrf.mxu3 }
 0x1e3   :  { %v405_v1 = vmul.f32 %v728_v61, %v384_v63 }
 0x1e5   :  { %v413_v17 = vadd.f32 %v405_v1, %v397_v0  ;;  %489 = vrot.lane.b32.xlu1 %v988_v37, %s807_s7  ;;  %v137_v0 = vpack.c.bf16 %v886_v13, %v886_v13 }
 0x1e7   :  { %v421_v3 = vpack.c.bf16 %v413_v17, %v413_v17  ;;  %v545_v17 = vunpack.c.l.b16 %v137_v0 }
 0x1e9   :  { %v440_v9 = vunpack.c.l.b16 %v421_v3 }
 0x1ea   :  { %v387_v15 = vpop.f32.mrf.mxu3 }
 0x1eb   :  { %v444_v16 = vpack.c.b16 %v440_v9, %v439_v8  ;;  %v406_v22 = vmul.f32 %v731_v14, %v387_v15 }
 0x1ed   :  { %v414_v21 = vadd.f32 %v406_v22, %v398_v18  ;;  %v454_v4 = vsel %vm446_vm10, %v444_v16, 0 }
 0x1ef   :  { %v422_v12 = vpack.c.bf16 %v414_v21, %v414_v21 }
 0x1f1   :  { %v441_v28 = vunpack.c.l.b16 %v422_v12 }
 0x1f2   :  { %v389_v23 = vpop.f32.mrf.mxu3 }
 0x1f3   :  { %v407_v24 = vmul.f32 %v732_v19, %v389_v23 }
 0x1f5   :  { %v415_v25 = vadd.f32 %v407_v24, %v399_v10 }
 0x1f7   :  { %v423_v27 = vpack.c.bf16 %v415_v25, %v415_v25 }
 0x1f9   :  { %v442_v29 = vunpack.c.l.b16 %v423_v27 }
 0x1fb   :  { %v445_v30 = vpack.c.b16 %v442_v29, %v441_v28 }
 0x1fd   :  { %495 = vrot.lane.b32.xlu0 %v445_v30, %s807_s7  ;;  %v457_v31 = vsel %vm446_vm10, %v445_v30, 0 }
 0x1fe   :  { %464 = vmatpush.bf16.xpose.msrb.mxu0 %v457_v31 }
 0x205   :  { %493 = vrot.lane.b32.xlu0 %v444_v16, %s807_s7 }
 0x206   :  { %465 = vmatpush.bf16.xpose.msrb.mxu0 %v454_v4 }
 0x20e   :  { %466 = vmatpush.bf16.xpose.msrb.mxu0 %v451_v5 }
 0x215   :  { %685 = vmatmul.msk.bf16.vlgmr.msrb.gmra.mxu0 %vm446_vm10, %v988_v37  ;;  %v424_v37 = vld [vmem:[%s1053_s5] sm:$0xff]  ;;  %s808_s5 = smov [#allocation2]  }
 0x216   :  { %s611_s12 = sshll.u32 %s808_s5, 4  ;;  %s612_s12 = int_to_ptr.vmem [resolvable:$true] %s611_s12 }
 0x24f   :  { %v492_v7 = vpop.permute.xlu1 %491 }
 0x250   :  { %v501_v38 = vsel %vm446_vm10, %v492_v7, 0 }
 0x257   :  { %v490_v40 = vpop.permute.xlu1 %489 }
 0x26f   :  { %v496_v6 = vpop.permute.xlu0 %495 }
 0x270   :  { %v507_v32 = vsel %vm446_vm10, %v496_v6, 0 }
 0x271   :  { %514 = vmatpush.bf16.xpose.msra.mxu0 %v507_v32 }
 0x277   :  { %v494_v35 = vpop.permute.xlu0 %493 }
 0x278   :  { %v504_v36 = vsel %vm446_vm10, %v494_v35, 0 }
 0x279   :  { %515 = vmatpush.bf16.xpose.msra.mxu0 %v504_v36 }
 0x281   :  { %516 = vmatpush.bf16.xpose.msra.mxu0 %v501_v38 }
 0x288   :  { %686 = vmatmul.msk.bf16.vlgmr.msra.gmra.mxu0 %vm446_vm10, %v490_v40 }
 0x289   :  { %596 = vmatpush.bf16.msrb.mxu0 %v936_v45 }
 0x292   :  { %v468_v41 = vpop.f32.mrf.mxu0 }
 0x293   :  { %v469_v42 = vadd.f32 %v468_v41, %v424_v37 }
 0x295   :  { %v473_v43 = vmul.f32 1.442695, %v469_v42 }
 0x297   :  { %763 = vpow2.f32 %v473_v43 }
 0x29a   :  { %v470_v46 = vpop.f32.mrf.mxu0 }
 0x29b   :  { %v471_v47 = vadd.f32 %v470_v46, %v425_v44 }
 0x29d   :  { %v764_v48 = vpop.eup %763  ;;  %v475_v45 = vmul.f32 1.442695, %v471_v47 }
 0x29e   :  { %v478_v49 = vsel %vm477_vm11, %v764_v48, 0.0 }
 0x29f   :  { %765 = vpow2.f32 %v475_v45  ;;  %479 = vadd.xlane.f32.xlu2 %v478_v49 }
 0x2a5   :  { %v766_v50 = vpop.eup %765 }
 0x2a6   :  { %v481_v51 = vsel %vm477_vm11, %v766_v50, 0.0 }
 0x2a7   :  { %482 = vadd.xlane.f32.xlu2 %v481_v51 }
 0x2bf   :  { %581 = vrot.lane.b32.xlu2 %v926_v39, %s806_s14  ;;  %v136_v39 = vpack.c.bf16 %v882_v11, %v882_v11 }
 0x2c1   :  { %v544_v2 = vunpack.c.l.b16 %v136_v39 }
 0x2c3   :  { %v550_v14 = vpack.c.b16 %v545_v17, %v544_v2 }
 0x305   :  { %v518_v52 = vpop.f32.mrf.mxu0 }
 0x306   :  { %v519_v33 = vadd.f32 %v518_v52, %v424_v37 }
 0x308   :  { %v523_v53 = vmul.f32 1.442695, %v519_v33 }
 0x30a   :  { %767 = vpow2.f32 %v523_v53 }
 0x30d   :  { %v520_v54 = vpop.f32.mrf.mxu0 }
 0x30e   :  { %v521_v55 = vadd.f32 %v520_v54, %v425_v44 }
 0x310   :  { %v768_v58 = vpop.eup %767  ;;  %v525_v59 = vmul.f32 1.442695, %v521_v55 }
 0x311   :  { %v527_v34 = vsel %vm477_vm11, %v768_v58, 0.0 }
 0x312   :  { %769 = vpow2.f32 %v525_v59  ;;  %528 = vadd.xlane.f32.xlu0 %v527_v34  ;;  %v480_v60 = vpop.xlane.xlu2 %479 }
 0x313   :  { %771 = vrcp.f32 %v480_v60 }
 0x318   :  { %v770_v61 = vpop.eup %769 }
 0x319   :  { %v530_v62 = vsel %vm477_vm11, %v770_v61, 0.0  ;;  %v772_v1 = vpop.eup %771 }
 0x31a   :  { %531 = vadd.xlane.f32.xlu1 %v530_v62  ;;  %v483_v63 = vpop.xlane.xlu2 %482  ;;  %v486_v3 = vmul.f32 %v772_v1, %v764_v48 }
 0x31b   :  { %773 = vrcp.f32 %v483_v63 }
 0x321   :  { %v774_v20 = vpop.eup %773 }
 0x322   :  { %v487_v56 = vmul.f32 %v774_v20, %v766_v50  ;;  %v582_v8 = vpop.permute.xlu2 %581 }
 0x323   :  { %597 = vmatpush.bf16.msrb.mxu0 %v582_v8 }
 0x324   :  { %v488_v9 = vpack.c.bf16 %v487_v56, %v486_v3 }
 0x326   :  { %553 = vrot.lane.b32.xlu0 %v550_v14, %s805_s1 }
 0x333   :  { %579 = vrot.lane.b32.xlu1 %v550_v14, %s806_s14  ;;  %s613_s14 = sshll.u32 %s1054_s6, 4  ;;  %s614_s14 = int_to_ptr.hbm [resolvable:$true] %s613_s14 }
 0x385   :  { %v529_v15 = vpop.xlane.xlu0 %528 }
 0x38d   :  { %v532_v57 = vpop.xlane.xlu1 %531 }
 0x38e   :  { %775 = vrcp.f32 %v532_v57 }
 0x38f   :  { %777 = vrcp.f32 %v529_v15 }
 0x394   :  { %v776_v11 = vpop.eup %775 }
 0x395   :  { %v778_v13 = vpop.eup %777  ;;  %v536_v16 = vmul.f32 %v776_v11, %v770_v61 }
 0x396   :  { %v535_v22 = vmul.f32 %v778_v13, %v768_v58 }
 0x398   :  { %v554_v18 = vpop.permute.xlu0 %553  ;;  %v537_v26 = vpack.c.bf16 %v536_v16, %v535_v22 }
 0x399   :  { %572 = vmatpush.bf16.msrb.mxu1 %v554_v18 }
 0x39c   :  { %687 = vmatmul.msk.bf16.vlgmr.msrb.gmra.mxu1 %vm477_vm11, %v537_v26 }
 0x3a5   :  { %v580_v19 = vpop.permute.xlu1 %579 }
 0x3a6   :  { %598 = vmatpush.bf16.msrb.mxu0 %v580_v19 }
 0x3a9   :  { %688 = vmatmul.msk.bf16.vlgmr.msrb.gmra.mxu0 %vm477_vm11, %v488_v9 }
 0x419   :  { %v574_v21 = vpop.f32.mrf.mxu1 }
 0x421   :  { %v576_v24 = vpop.f32.mrf.mxu1 }
 0x426   :  { %v600_v23 = vpop.f32.mrf.mxu0 }
 0x427   :  { %v601_v10 = vadd.f32 %v600_v23, %v574_v21 }
 0x429   :  { %605 = vst.msk [vmem:[#allocation2] sm:$0xff] %vm48_vm0, %v601_v10 }
 0x42e   :  { %v602_v12 = vpop.f32.mrf.mxu0 }
 0x42f   :  { %v603_v25 = vadd.f32 %v602_v12, %v576_v24 }
 0x431   :  { %606 = vst.msk [vmem:[#allocation2 + $0x8] sm:$0xff] %vm48_vm0, %v603_v25 }
 0x432   :  { %619 = dma.vmem_to_hbm [thread:$0]  %s612_s12, 256, %s614_s14, [#allocation3], %s809_s15, %s809_s15, %s810_s16  }
 0x433   :  { %803 = dma.done.wait [#allocation3], 256  }
 0x434   :  { %804 = vsyncadd [#allocation3], 4294967040 }
 0x435   :  { %624 = vsyncpa [#allocation3], 1 }

</bundles_post_ra>
